<compile_context>
chip_gen: v7x
topology: tpu7x:2x2x1
jax: 0.10.0
libtpu: 0.0.40
codegen_flags: <defaults>
</compile_context>

<pallas_src>
import jax
import jax.numpy as jnp
import numpy as np
from jax.experimental import pallas as pl
from jax.experimental.pallas import tpu as pltpu

EPS = 1e-5  # torch.nn.LayerNorm default eps


# ----------------------------- kernels ------------------------------------ #
def _ln_m_kernel(m_ref, g_ref, b_ref, o_ref):
    """LayerNorm over the last (channel) dim of a row-tile of the first MSA row."""
    x = m_ref[...].astype(jnp.float32)                       # (TM, c_m)
    mu = jnp.mean(x, axis=-1, keepdims=True)
    xc = x - mu
    var = jnp.mean(xc * xc, axis=-1, keepdims=True)
    y = xc * jax.lax.rsqrt(var + EPS)
    o_ref[...] = (y * g_ref[...] + b_ref[...]).astype(o_ref.dtype)


def _z_kernel(z_ref, xi_ref, xjt_ref, gz_ref, bz_ref, dw_ref, lb_ref, lo_ref,
              o_ref):
    """Fused: LayerNorm(z) + distogram + (bins -> c_z) projection + residual.

    Block shapes:
      z_ref  : (TILE_I, TILE_J, c_z)   (i, j) tile of the pair representation
      xi_ref : (TILE_I, 3)             pseudo-beta coords of the row tile
      xjt_ref: (3, TILE_J)             pseudo-beta coords of the column tile (transposed)
      dw_ref : (bin_count, c_z)        telescoped linear weight  dW[b] = W^T[b] - W^T[b-1]
      lo_ref : (1, bin_count)          squared lower bin edges
    """
    # --- LayerNorm(z) over the channel dim (centered tensor reused) ---
    z = z_ref[...].astype(jnp.float32)                       # (TI, TJ, Cz)
    mu = jnp.mean(z, axis=-1, keepdims=True)
    zc = z - mu
    var = jnp.mean(zc * zc, axis=-1, keepdims=True)
    zn = zc * jax.lax.rsqrt(var + EPS) * gz_ref[...] + bz_ref[...]

    # --- lane-dense pairwise squared distances: j on lanes ---
    xi = xi_ref[...].astype(jnp.float32)                     # (TI, 3)
    xj = xjt_ref[...].astype(jnp.float32)                    # (3, TJ)
    d0 = xi[:, 0:1] - xj[0:1, :]                             # (TI, TJ)
    d1 = xi[:, 1:2] - xj[1:2, :]
    d2c = xi[:, 2:3] - xj[2:3, :]
    d2 = d0 * d0 + d1 * d1 + d2c * d2c                       # (TI, TJ)

    # --- telescoped distogram projection (strict lower-edge compares only) ---
    step = (d2[:, :, None] > lo_ref[...]).astype(jnp.float32)  # (TI, TJ, B)
    proj = jax.lax.dot_general(
        step, dw_ref[...],
        dimension_numbers=(((2,), (0,)), ((), ())),
        preferred_element_type=jnp.float32)                  # (TI, TJ, Cz)

    o_ref[...] = (zn + proj + lb_ref[...]).astype(o_ref.dtype)


# ----------------------------- helpers ------------------------------------ #
def _choose_tile(n, preferred, multiple):
    """Largest divisor of n that is <= preferred and a multiple of `multiple`;
    falls back to n (full dim) if none exists or n is already small."""
    if n <= preferred:
        return n
    for t in range(preferred, 0, -1):
        if n % t == 0 and t % multiple == 0:
            return t
    return n


# ----------------------------- wrapper ------------------------------------ #
def recycling_embedder(m_prev, z_prev, x_prev, params, *,
                       bin_start=3.25, bin_end=20.75, bin_count=15,
                       tile_i=32, tile_j=256, tile_m=256,
                       vmem_limit_bytes=48 * 1024 * 1024):
    N_res = z_prev.shape[0]
    c_m = m_prev.shape[-1]
    c_z = z_prev.shape[-1]

    ti = _choose_tile(N_res, tile_i, 8)     # row tile (sublane-constrained via xi block)
    tj = _choose_tile(N_res, tile_j, 128)   # col tile (lane-constrained via x^T block)
    tm = _choose_tile(N_res, tile_m, 8)     # m-branch row tile

    # squared lower bin edges; telescoped weight differences
    bins = jnp.linspace(bin_start, bin_end, bin_count, dtype=jnp.float32)
    sq_lo = (bins ** 2).reshape(1, bin_count)
    w_t = params["linear_w"].T.astype(jnp.float32)           # (B, c_z)
    dw = w_t - jnp.concatenate(
        [jnp.zeros((1, c_z), w_t.dtype), w_t[:-1]], axis=0)  # dW[0]=W^T[0]

    # ----- m branch: LayerNorm on the first MSA row (row-tiled) -----
    m0 = m_prev[..., 0, :, :]                                # (N_res, c_m)
    g_m = params["ln_m_gamma"].reshape(1, c_m).astype(jnp.float32)
    b_m = params["ln_m_beta"].reshape(1, c_m).astype(jnp.float32)
    m_out = pl.pallas_call(
        _ln_m_kernel,
        out_shape=jax.ShapeDtypeStruct((N_res, c_m), m_prev.dtype),
        grid=(N_res // tm,),
        in_specs=[pl.BlockSpec((tm, c_m), lambda i: (i, 0)),
                  pl.BlockSpec((1, c_m), lambda i: (0, 0)),
                  pl.BlockSpec((1, c_m), lambda i: (0, 0))],
        out_specs=pl.BlockSpec((tm, c_m), lambda i: (i, 0)),
        compiler_params=pltpu.CompilerParams(
            dimension_semantics=("parallel",)),
    )(m0, g_m, b_m)

    # ----- z branch: fused LN + distogram + linear + residual (i,j tiled) -----
    g_z = params["ln_z_gamma"].reshape(1, c_z).astype(jnp.float32)
    b_z = params["ln_z_beta"].reshape(1, c_z).astype(jnp.float32)
    l_b = params["linear_b"].reshape(1, c_z).astype(jnp.float32)
    x_t = x_prev.T                                           # (3, N_res), lane-dense j

    z_out = pl.pallas_call(
        _z_kernel,
        out_shape=jax.ShapeDtypeStruct((N_res, N_res, c_z), z_prev.dtype),
        grid=(N_res // ti, N_res // tj),
        in_specs=[
            pl.BlockSpec((ti, tj, c_z), lambda i, j: (i, j, 0)),  # z tile
            pl.BlockSpec((ti, 3), lambda i, j: (i, 0)),           # x rows of tile i
            pl.BlockSpec((3, tj), lambda i, j: (0, j)),           # x cols of tile j (T)
            pl.BlockSpec((1, c_z), lambda i, j: (0, 0)),          # gamma_z
            pl.BlockSpec((1, c_z), lambda i, j: (0, 0)),          # beta_z
            pl.BlockSpec((bin_count, c_z), lambda i, j: (0, 0)),  # telescoped W^T
            pl.BlockSpec((1, c_z), lambda i, j: (0, 0)),          # linear bias
            pl.BlockSpec((1, bin_count), lambda i, j: (0, 0)),    # lower bin edges^2
        ],
        out_specs=pl.BlockSpec((ti, tj, c_z), lambda i, j: (i, j, 0)),
        compiler_params=pltpu.CompilerParams(
            dimension_semantics=("parallel", "parallel"),
            vmem_limit_bytes=vmem_limit_bytes),
    )(z_prev, x_prev, x_t, g_z, b_z, dw, l_b, sq_lo)

    return m_out, z_out


# ----------------------------- reference ---------------------------------- #
def _reference(m_prev, z_prev, x_prev, params,
               bin_start=3.25, bin_end=20.75, bin_count=15):
    def ln(x, g, b):
        mu = x.mean(-1, keepdims=True)
        var = ((x - mu) ** 2).mean(-1, keepdims=True)
        return (x - mu) / jnp.sqrt(var + EPS) * g + b

    m_out = ln(m_prev[..., 0, :, :], params["ln_m_gamma"], params["ln_m_beta"])
    z_out = ln(z_prev, params["ln_z_gamma"], params["ln_z_beta"])

    bins = jnp.linspace(bin_start, bin_end, bin_count, dtype=jnp.float32)
    sq = bins ** 2
    up = jnp.concatenate([sq[1:], jnp.array([1e9], jnp.float32)])
    d = jnp.sum((x_prev[:, None, :] - x_prev[None, :, :]) ** 2, -1,
                keepdims=True)
    oh = jnp.logical_and(d > sq, d < up).astype(jnp.float32)
    z_out = z_out + oh @ params["linear_w"].T + params["linear_b"]
    return m_out, z_out


# ------------------------------- main -------------------------------------- #
if __name__ == "__main__":
    key = jax.random.PRNGKey(0)
    N_seq, N_res, c_m, c_z, bin_count = 4, 16, 32, 32, 15
    k1, k2, k3, k4, k5 = jax.random.split(key, 5)

    m_prev = jax.random.normal(k1, (N_seq, N_res, c_m), jnp.float32)
    z_prev = jax.random.normal(k2, (N_res, N_res, c_z), jnp.float32)
    x_prev = 10.0 * jax.random.normal(k3, (N_res, 3), jnp.float32)  # Angstrom-ish

    # Deterministic synthetic parameters (shapes implied by Algorithm 32).
    params = {
        "ln_m_gamma": jnp.full((c_m,), 1.1, jnp.float32),
        "ln_m_beta":  jnp.full((c_m,), 0.05, jnp.float32),
        "ln_z_gamma": jnp.full((c_z,), 0.9, jnp.float32),
        "ln_z_beta":  jnp.full((c_z,), -0.02, jnp.float32),
        "linear_w":   0.1 * jax.random.normal(k4, (c_z, bin_count), jnp.float32),
        "linear_b":   0.01 * jax.random.normal(k5, (c_z,), jnp.float32),
    }

    m_out, z_out = recycling_embedder(m_prev, z_prev, x_prev, params)
    jax.block_until_ready((m_out, z_out))

    m_ref, z_ref = _reference(m_prev, z_prev, x_prev, params)
    assert m_out.shape == (N_res, c_m) and z_out.shape == (N_res, N_res, c_z)
    assert np.allclose(np.asarray(m_out), np.asarray(m_ref), atol=1e-4), "m_out mismatch"
    assert np.allclose(np.asarray(z_out), np.asarray(z_ref), atol=1e-4), "z_out mismatch"
    print("KERNEL_OK")
</pallas_src>

<mosaic_0001>
module attributes {stable_mosaic.version = 11 : i64} {
  func.func @_ln_m_kernel(%arg0: i32, %arg1: memref<16x32xf32, #tpu.memory_space<vmem>>, %arg2: memref<1x32xf32, #tpu.memory_space<vmem>>, %arg3: memref<1x32xf32, #tpu.memory_space<vmem>>, %arg4: memref<16x32xf32, #tpu.memory_space<vmem>>) attributes {dimension_semantics = [#tpu.dimension_semantics<parallel>], iteration_bounds = array<i64: 1>, scalar_prefetch = 0 : i64, scratch_operands = 0 : i64, tpu.core_type = #tpu.core_type<tc>, window_params = [{transform_indices = @transform_0, window_bounds = array<i64: 16, 32>}, {pipeline_mode = #tpu.pipeline_mode<synchronous>, transform_indices = @transform_1, window_bounds = array<i64: 1, 32>}, {pipeline_mode = #tpu.pipeline_mode<synchronous>, transform_indices = @transform_2, window_bounds = array<i64: 1, 32>}, {transform_indices = @transform_3, window_bounds = array<i64: 16, 32>}]} {
    %c0 = arith.constant 0 : index
    %c0_0 = arith.constant 0 : index
    %0 = vector.load %arg1[%c0, %c0_0] : memref<16x32xf32, #tpu.memory_space<vmem>>, vector<16x32xf32>
    %cst = arith.constant dense<0.000000e+00> : vector<16xf32>
    %1 = vector.multi_reduction <add>, %0, %cst [1] : vector<16x32xf32> to vector<16xf32>
    %2 = vector.shape_cast %1 : vector<16xf32> to vector<16x1xf32>
    %cst_1 = arith.constant 3.200000e+01 : f32
    %3 = vector.broadcast %cst_1 : f32 to vector<16x1xf32>
    %4 = arith.divf %2, %3 : vector<16x1xf32>
    %5 = vector.broadcast %4 : vector<16x1xf32> to vector<16x32xf32>
    %6 = arith.subf %0, %5 : vector<16x32xf32>
    %7 = arith.mulf %6, %6 : vector<16x32xf32>
    %cst_2 = arith.constant dense<0.000000e+00> : vector<16xf32>
    %8 = vector.multi_reduction <add>, %7, %cst_2 [1] : vector<16x32xf32> to vector<16xf32>
    %9 = vector.shape_cast %8 : vector<16xf32> to vector<16x1xf32>
    %cst_3 = arith.constant 3.200000e+01 : f32
    %10 = vector.broadcast %cst_3 : f32 to vector<16x1xf32>
    %11 = arith.divf %9, %10 : vector<16x1xf32>
    %cst_4 = arith.constant 9.99999974E-6 : f32
    %12 = vector.broadcast %cst_4 : f32 to vector<16x1xf32>
    %13 = arith.addf %11, %12 : vector<16x1xf32>
    %14 = math.rsqrt %13 : vector<16x1xf32>
    %15 = vector.broadcast %14 : vector<16x1xf32> to vector<16x32xf32>
    %16 = arith.mulf %6, %15 : vector<16x32xf32>
    %c0_5 = arith.constant 0 : index
    %c0_6 = arith.constant 0 : index
    %17 = vector.load %arg2[%c0_5, %c0_6] : memref<1x32xf32, #tpu.memory_space<vmem>>, vector<1x32xf32>
    %18 = vector.broadcast %17 : vector<1x32xf32> to vector<16x32xf32>
    %19 = arith.mulf %16, %18 : vector<16x32xf32>
    %c0_7 = arith.constant 0 : index
    %c0_8 = arith.constant 0 : index
    %20 = vector.load %arg3[%c0_7, %c0_8] : memref<1x32xf32, #tpu.memory_space<vmem>>, vector<1x32xf32>
    %21 = vector.broadcast %20 : vector<1x32xf32> to vector<16x32xf32>
    %22 = arith.addf %19, %21 : vector<16x32xf32>
    %c0_9 = arith.constant 0 : index
    %c0_10 = arith.constant 0 : index
    %23 = vector.load %arg4[%c0_9, %c0_10] : memref<16x32xf32, #tpu.memory_space<vmem>>, vector<16x32xf32>
    tpu.vector_store %arg4[%c0_9, %c0_10], %22 {strides = array<i32>} : memref<16x32xf32, #tpu.memory_space<vmem>>, vector<16x32xf32>,
    return
  }
  func.func @transform_0(%arg0: i32) -> (i32, i32) {
    %c0_i32 = arith.constant 0 : i32
    %c0_i32_0 = arith.constant 0 : i32
    return %arg0, %c0_i32 : i32, i32
  }
  func.func @transform_1(%arg0: i32) -> (i32, i32) {
    %c0_i32 = arith.constant 0 : i32
    %c0_i32_0 = arith.constant 0 : i32
    %c0_i32_1 = arith.constant 0 : i32
    return %c0_i32, %c0_i32_0 : i32, i32
  }
  func.func @transform_2(%arg0: i32) -> (i32, i32) {
    %c0_i32 = arith.constant 0 : i32
    %c0_i32_0 = arith.constant 0 : i32
    %c0_i32_1 = arith.constant 0 : i32
    return %c0_i32, %c0_i32_0 : i32, i32
  }
  func.func @transform_3(%arg0: i32) -> (i32, i32) {
    %c0_i32 = arith.constant 0 : i32
    %c0_i32_0 = arith.constant 0 : i32
    return %arg0, %c0_i32 : i32, i32
  }
}

</mosaic_0001>

<bundles_post_ra>
// kernel: tpu_custom_call.1
= control target key start
LH: loop header
LB: loop body
LE: loop exit
PB: predicated region body
PF: predicated region fallthrough
CT: control target
= control target key end

     0   :  { %8 = vsyncpa [#allocation3], 0  ;;  %s220_s0 = inlined_call_operand.hbm [shape: f32[16,32], index: 0, kind: input, shape index: {}]   ;;  %s221_s1 = inlined_call_operand.vmem [shape: f32[1,32], index: 1, kind: input, shape index: {}]   ;;  %s222_s2 = inlined_call_operand.vmem [shape: f32[1,32], index: 2, kind: input, shape index: {}]   ;;  %s223_s3 = inlined_call_operand.hbm [shape: f32[16,32], index: 3, kind: output, shape index: {}]  }
   0x1   :  { %9 = vsyncpa [#allocation4], 0  ;;  %s154_s12 = smov [#allocation2]   ;;  %s106_s16 = scalar_lea.hbm %s220_s0, 256 }
   0x2   :  { %s15_s13 = sshll.u32 %s154_s12, 4  ;;  %p107_p0 = scmp.ne.s32.totalorder %s220_s0, %s106_s16  ;;  %s16_s13 = int_to_ptr.vmem [resolvable:$true] %s15_s13 }
   0x3   :  { %p110_p1 = scmp.lt.u32.totalorder %s106_s16, %s220_s0 }
   0x5   :  { %p112_p2 = pnand %p110_p1, %p107_p0 }
   0x7   :  { %115 = shalt.err (!%p112_p2)
}
   0x8   :  { %s116_s21 = scalar_lea.vmem %s16_s13, 256  ;;  %p121_p4 = scmp.lt.s32.totalorder %s16_s13, %s16_s13 }
   0x9   :  { %p117_p3 = scmp.ne.s32.totalorder %s16_s13, %s116_s21  ;;  %p122_p5 = scmp.lt.s32.totalorder %s116_s21, %s116_s21 }
   0xb   :  { %p123_p6 = por %p122_p5, %p121_p4 }
   0xd   :  { %p124_p7 = pnand %p123_p6, %p117_p3 }
   0xf   :  { %127 = shalt.err (!%p124_p7)
}
  0x10   :  { %s155_s22 = smov 128   ;;  %s156_s23 = smov 8  }
  0x11   :  { %21 = dma.hbm_to_vmem [thread:$0]  %s220_s0, 256, %s16_s13, [#allocation3], %s155_s22, %s155_s22, %s156_s23  }
  0x12   :  { %150 = dma.done.wait [#allocation3], 256  }
  0x13   :  { %151 = vsyncadd [#allocation3], 4294967040  ;;  %vm31_vm0 = vcmask 261120   ;;  %v29_v0 = vld [vmem:[#allocation2] sm:$0xff]  ;;  %v30_v1 = vld [vmem:[#allocation2 + $0x8] sm:$0xff]  ;;  %s157_s29 = smov [#allocation5]  }
  0x14   :  { %v32_v2 = vsel %vm31_vm0, %v29_v0, 0.0  ;;  %v35_v3 = vsel %vm31_vm0, %v30_v1, 0.0  ;;  %v96_v21 = vld [vmem:[%s221_s1] ss:$0 sm:$0xff]  ;;  %s84_s30 = sshll.u32 %s157_s29, 4  ;;  %s85_s30 = int_to_ptr.vmem [resolvable:$true] %s84_s30 }
  0x15   :  { %33 = vadd.xlane.f32.xlu0 %v32_v2  ;;  %v97_v23 = vld [vmem:[%s222_s2] ss:$0 sm:$0xff]  ;;  %s128_s4 = scalar_lea.vmem %s85_s30, 256  ;;  %p133_p9 = scmp.lt.s32.totalorder %s85_s30, %s85_s30 }
  0x16   :  { %p129_p8 = scmp.ne.s32.totalorder %s85_s30, %s128_s4  ;;  %p134_p10 = scmp.lt.s32.totalorder %s128_s4, %s128_s4 }
  0x18   :  { %p135_p11 = por %p134_p10, %p133_p9 }
  0x19   :  { %36 = vadd.xlane.f32.xlu0 %v35_v3 }
  0x1a   :  { %p136_p12 = pnand %p135_p11, %p129_p8 }
  0xa2   :  { %v34_v4 = vpop.xlane.xlu0 %33 }
  0xa3   :  { %v39_v5 = vmul.f32 0.03125, %v34_v4 }
  0xa5   :  { %v41_v6 = vsub.f32 %v29_v0, %v39_v5 }
  0xa6   :  { %v37_v7 = vpop.xlane.xlu0 %36 }
  0xa7   :  { %v40_v8 = vmul.f32 0.03125, %v37_v7  ;;  %v43_v9 = vmul.f32 %v41_v6, %v41_v6 }
  0xa9   :  { %v42_v10 = vsub.f32 %v30_v1, %v40_v8  ;;  %v45_v11 = vsel %vm31_vm0, %v43_v9, 0.0 }
  0xaa   :  { %46 = vadd.xlane.f32.xlu1 %v45_v11 }
  0xab   :  { %v44_v12 = vmul.f32 %v42_v10, %v42_v10 }
  0xad   :  { %v48_v13 = vsel %vm31_vm0, %v44_v12, 0.0 }
  0xae   :  { %49 = vadd.xlane.f32.xlu1 %v48_v13 }
 0x137   :  { %v47_v14 = vpop.xlane.xlu1 %46 }
 0x138   :  { %v51_v15 = vmul.f32 0.03125, %v47_v14 }
 0x13a   :  { %v53_v16 = vadd.f32 1e-05, %v51_v15 }
 0x13b   :  { %v50_v17 = vpop.xlane.xlu1 %49 }
 0x13c   :  { %102 = vrsqrt.f32 %v53_v16  ;;  %v52_v18 = vmul.f32 0.03125, %v50_v17 }
 0x13e   :  { %v54_v19 = vadd.f32 1e-05, %v52_v18 }
 0x140   :  { %104 = vrsqrt.f32 %v54_v19 }
 0x146   :  { %v103_v20 = vpop.eup %102 }
 0x147   :  { %v57_v22 = vmul.f32 %v103_v20, %v41_v6 }
 0x149   :  { %v66_v24 = vmul.f32 %v96_v21, %v57_v22 }
 0x14a   :  { %v105_v25 = vpop.eup %104 }
 0x14b   :  { %v58_v26 = vmul.f32 %v105_v25, %v42_v10  ;;  %v75_v27 = vadd.f32 %v97_v23, %v66_v24 }
 0x14d   :  { %v67_v28 = vmul.f32 %v96_v21, %v58_v26  ;;  %77 = vst.msk [vmem:[#allocation5] sm:$0xff] %vm31_vm0, %v75_v27 }
 0x14f   :  { %v76_v29 = vadd.f32 %v97_v23, %v67_v28 }
 0x151   :  { %78 = vst.msk [vmem:[#allocation5 + $0x8] sm:$0xff] %vm31_vm0, %v76_v29 }
 0x152   :  { %139 = shalt.err (!%p136_p12)
}
 0x153   :  { %s140_s5 = scalar_lea.hbm %s223_s3, 256 }
 0x154   :  { %p141_p13 = scmp.ne.s32.totalorder %s223_s3, %s140_s5  ;;  %p144_p0 = scmp.lt.u32.totalorder %s140_s5, %s223_s3 }
 0x156   :  { %p146_p1 = pnand %p144_p0, %p141_p13 }
 0x158   :  { %149 = shalt.err (!%p146_p1)
}
 0x159   :  { %90 = dma.vmem_to_hbm [thread:$0]  %s85_s30, 256, %s223_s3, [#allocation4], %s155_s22, %s155_s22, %s156_s23  }
 0x15a   :  { %152 = dma.done.wait [#allocation4], 256  }
 0x15b   :  { %153 = vsyncadd [#allocation4], 4294967040 }
 0x15c   :  { %94 = vsyncpa [#allocation3], 1 }
 0x15d   :  { %95 = vsyncpa [#allocation4], 1 }

</bundles_post_ra>
